<compile_context>
chip_gen: v5e
topology: v5e:2x2
jax: 0.10.0
libtpu: 0.0.40
codegen_flags: <defaults>
</compile_context>

<pallas_src>
import functools

import jax
import jax.numpy as jnp
from jax.experimental import pallas as pl
from jax.experimental.pallas import tpu as pltpu


def _decoder_norm_kernel(x_ref, gb_ref, o_ref, *, eps, d_model):
    # x_ref: (tm, d_model) VMEM tile; gb_ref: (2,) SMEM -> [gain, bias]
    x = x_ref[...].astype(jnp.float32)
    mean = jnp.mean(x, axis=-1, keepdims=True)
    centered = x - mean
    # PyTorch's x.std() defaults to the unbiased estimator (divide by D-1).
    var = jnp.sum(centered * centered, axis=-1, keepdims=True) * (
        1.0 / float(d_model - 1)
    )
    std = jnp.sqrt(var)
    gain = gb_ref[0]
    bias = gb_ref[1]
    o_ref[...] = (centered / (std + eps) * gain + bias).astype(o_ref.dtype)


def decoder_forward(x, encoder_out=None, src_mask=None, tgt_mask=None, *,
                    gain, bias, eps=1e-6, max_tm=512):
    """Decoder.forward with an empty layer stack: final LayerNormalization.

    x: (..., d_model). encoder_out / src_mask / tgt_mask are accepted for
    signature fidelity but unused (no decoder layers are defined in the spec).
    gain, bias: scalar parameters of shape (1,) (PyTorch nn.Parameter).
    """
    del encoder_out, src_mask, tgt_mask  # consumed only by the (absent) layers

    *lead, d_model = x.shape
    M = 1
    for s in lead:
        M *= s
    x2 = x.reshape(M, d_model)

    # Biggest row tile that keeps double-buffered (tm, d_model) f32 tiles well
    # under every generation's scoped-VMEM budget (v5e 16 MiB / v7x 32 MiB):
    # a single grid step when M is small, else 512-row tiles with Pallas
    # handling the remainder block (rows are independent, so masked edge rows
    # never contaminate valid output).
    tm = M if M <= max_tm else max_tm
    grid = (pl.cdiv(M, tm),)

    gb = jnp.concatenate(
        [jnp.reshape(gain, (1,)), jnp.reshape(bias, (1,))]
    ).astype(jnp.float32)

    kernel = functools.partial(_decoder_norm_kernel, eps=eps, d_model=d_model)

    out = pl.pallas_call(
        kernel,
        out_shape=jax.ShapeDtypeStruct((M, d_model), x.dtype),
        grid=grid,
        in_specs=[
            pl.BlockSpec((tm, d_model), lambda i: (i, 0)),
            pl.BlockSpec(memory_space=pltpu.MemorySpace.SMEM),
        ],
        out_specs=pl.BlockSpec((tm, d_model), lambda i: (i, 0)),
        compiler_params=pltpu.CompilerParams(
            dimension_semantics=("parallel",)
        ),
    )(x2, gb)

    return out.reshape(*lead, d_model)


if __name__ == "__main__":
    # Small shapes consistent with the transformer Decoder forward.
    batch, seq_len, d_model = 2, 8, 32

    key = jax.random.PRNGKey(0)
    kx, ke = jax.random.split(key, 2)
    x = jax.random.normal(kx, (batch, seq_len, d_model), jnp.float32)
    encoder_out = jax.random.normal(ke, (batch, seq_len, d_model), jnp.float32)
    src_mask = jnp.ones((batch, 1, 1, seq_len), jnp.float32)
    tgt_mask = jnp.ones((batch, 1, seq_len, seq_len), jnp.float32)

    # Scalar LayerNormalization parameters (deterministic; non-trivial values
    # so the scale/shift path is actually exercised).
    gain = jnp.array([1.5], jnp.float32)
    bias = jnp.array([-0.25], jnp.float32)
    eps = 1e-6

    y = decoder_forward(x, encoder_out, src_mask, tgt_mask,
                        gain=gain, bias=bias, eps=eps)
    y = jax.block_until_ready(y)

    # Pure-JAX reference matching the PyTorch module exactly
    # (unbiased std, eps added to std — not to the variance).
    mean = jnp.mean(x, axis=-1, keepdims=True)
    std = jnp.sqrt(
        jnp.sum((x - mean) ** 2, axis=-1, keepdims=True) / (d_model - 1)
    )
    y_ref = (x - mean) / (std + eps) * gain + bias

    assert y.shape == (batch, seq_len, d_model)
    assert jnp.allclose(y, y_ref, atol=1e-5, rtol=1e-5)

    print("KERNEL_OK")
</pallas_src>

<mosaic_0001>
module attributes {stable_mosaic.version = 11 : i64} {
  func.func @_decoder_norm_kernel(%arg0: i32, %arg1: memref<16x32xf32, #tpu.memory_space<vmem>>, %arg2: memref<2xf32, #tpu.memory_space<smem>>, %arg3: memref<16x32xf32, #tpu.memory_space<vmem>>) attributes {dimension_semantics = [#tpu.dimension_semantics<parallel>], iteration_bounds = array<i64: 1>, scalar_prefetch = 0 : i64, scratch_operands = 0 : i64, tpu.core_type = #tpu.core_type<tc>, window_params = [{transform_indices = @transform_0, window_bounds = array<i64: 16, 32>}, {transform_indices = @transform_1, window_bounds = array<i64: 2>}, {transform_indices = @transform_2, window_bounds = array<i64: 16, 32>}]} {
    %c0 = arith.constant 0 : index
    %c0_0 = arith.constant 0 : index
    %0 = vector.load %arg1[%c0, %c0_0] : memref<16x32xf32, #tpu.memory_space<vmem>>, vector<16x32xf32>
    %cst = arith.constant dense<0.000000e+00> : vector<16xf32>
    %1 = vector.multi_reduction <add>, %0, %cst [1] : vector<16x32xf32> to vector<16xf32>
    %2 = vector.shape_cast %1 : vector<16xf32> to vector<16x1xf32>
    %cst_1 = arith.constant 3.200000e+01 : f32
    %3 = vector.broadcast %cst_1 : f32 to vector<16x1xf32>
    %4 = arith.divf %2, %3 : vector<16x1xf32>
    %5 = vector.broadcast %4 : vector<16x1xf32> to vector<16x32xf32>
    %6 = arith.subf %0, %5 : vector<16x32xf32>
    %7 = arith.mulf %6, %6 : vector<16x32xf32>
    %cst_2 = arith.constant dense<0.000000e+00> : vector<16xf32>
    %8 = vector.multi_reduction <add>, %7, %cst_2 [1] : vector<16x32xf32> to vector<16xf32>
    %9 = vector.shape_cast %8 : vector<16xf32> to vector<16x1xf32>
    %cst_3 = arith.constant 0.0322580636 : f32
    %10 = vector.broadcast %cst_3 : f32 to vector<16x1xf32>
    %11 = arith.mulf %9, %10 : vector<16x1xf32>
    %12 = math.sqrt %11 : vector<16x1xf32>
    %c0_4 = arith.constant 0 : index
    %13 = memref.load %arg2[%c0_4] : memref<2xf32, #tpu.memory_space<smem>>
    %c1 = arith.constant 1 : index
    %14 = memref.load %arg2[%c1] : memref<2xf32, #tpu.memory_space<smem>>
    %cst_5 = arith.constant 9.99999997E-7 : f32
    %15 = vector.broadcast %cst_5 : f32 to vector<16x1xf32>
    %16 = arith.addf %12, %15 : vector<16x1xf32>
    %17 = vector.broadcast %16 : vector<16x1xf32> to vector<16x32xf32>
    %18 = arith.divf %6, %17 : vector<16x32xf32>
    %19 = vector.broadcast %13 : f32 to vector<16x32xf32>
    %20 = arith.mulf %18, %19 : vector<16x32xf32>
    %21 = vector.broadcast %14 : f32 to vector<16x32xf32>
    %22 = arith.addf %20, %21 : vector<16x32xf32>
    %c0_6 = arith.constant 0 : index
    %c0_7 = arith.constant 0 : index
    %23 = vector.load %arg3[%c0_6, %c0_7] : memref<16x32xf32, #tpu.memory_space<vmem>>, vector<16x32xf32>
    tpu.vector_store %arg3[%c0_6, %c0_7], %22 {strides = array<i32>} : memref<16x32xf32, #tpu.memory_space<vmem>>, vector<16x32xf32>,
    return
  }
  func.func @transform_0(%arg0: i32) -> (i32, i32) {
    %c0_i32 = arith.constant 0 : i32
    %c0_i32_0 = arith.constant 0 : i32
    return %arg0, %c0_i32 : i32, i32
  }
  func.func @transform_1(%arg0: i32) -> i32 {
    %c0_i32 = arith.constant 0 : i32
    %c0_i32_0 = arith.constant 0 : i32
    return %c0_i32 : i32
  }
  func.func @transform_2(%arg0: i32) -> (i32, i32) {
    %c0_i32 = arith.constant 0 : i32
    %c0_i32_0 = arith.constant 0 : i32
    return %arg0, %c0_i32 : i32, i32
  }
}

</mosaic_0001>

<bundles_post_ra>
// kernel: tpu_custom_call.1
= control target key start
LH: loop header
LB: loop body
LE: loop exit
PB: predicated region body
PF: predicated region fallthrough
CT: control target
= control target key end

     0   :  { %7 = vsyncpa [#allocation3], 0  ;;  %s298_s0 = inlined_call_operand.hbm [shape: f32[16,32], index: 0, kind: input, shape index: {}]   ;;  %s299_s1 = inlined_call_operand.hbm [shape: f32[2], index: 1, kind: input, shape index: {}]   ;;  %s300_s2 = inlined_call_operand.hbm [shape: f32[16,32], index: 2, kind: output, shape index: {}]  }
   0x1   :  { %8 = vsyncpa [#allocation5], 0 }
   0x2   :  { %9 = vsyncpa [#allocation4], 0  ;;  %s14_s11 = sshll.u32 %s298_s0, 4  ;;  %s240_s12 = smov [#allocation2]   ;;  %s15_s11 = int_to_ptr.hbm [resolvable:$true] %s14_s11 }
   0x3   :  { %s16_s13 = sshll.u32 %s240_s12, 4  ;;  %s28_s16 = sshll.u32 %s299_s1, 4  ;;  %s17_s13 = int_to_ptr.vmem [resolvable:$true] %s16_s13  ;;  %s29_s16 = int_to_ptr.hbm [resolvable:$true] %s28_s16 }
   0x4   :  { %s241_s17 = smov 128   ;;  %s242_s18 = smov 8  }
   0x5   :  { %22 = dma.hbm_to_vmem [thread:$0]  %s15_s11, 256, %s17_s13, [#allocation3], %s241_s17, %s241_s17, %s242_s18  }
   0x6   :  { %s243_s19 = smov [#allocation6]  }
   0x7   :  { %31 = dma.hbm_to_smem %s29_s16, 16, %s243_s19, [#allocation5]  }
   0x8   :  { %234 = dma.done.wait [#allocation3], 256  }
   0x9   :  { %235 = vsyncadd [#allocation3], 4294967040 }
   0xa   :  { %236 = dma.done.wait [#allocation5], 16  }
   0xb   :  { %237 = vsyncadd [#allocation5], 4294967280 }
   0xc   :  { %40 = sfence }
   0xd   :  { %v41_v0 = vld [vmem:[#allocation2] sm:$0xff]  ;;  %vm43_vm0 = vcmask 261120   ;;  %v42_v2 = vld [vmem:[#allocation2 + $0x8] sm:$0xff]  ;;  %v244_v4 = vmov 32.0   ;;  %s282_s0 = sld [smem:[#allocation6]]  ;;  %s245_s20 = smov [#allocation7]  }
   0xe   :  { %v44_v1 = vsel %vm43_vm0, %v41_v0, 0.0  ;;  %v47_v3 = vsel %vm43_vm0, %v42_v2, 0.0  ;;  %164 = vrcp.f32 %v244_v4  ;;  %s284_s1 = sld [smem:[#allocation6 + $0x1]]  ;;  %s141_s21 = sshll.u32 %s245_s20, 4  ;;  %s142_s21 = int_to_ptr.vmem [resolvable:$true] %s141_s21 }
   0xf   :  { %45 = vadd.xlane.f32.xlu0 %v44_v1  ;;  %s143_s24 = sshll.u32 %s300_s2, 4  ;;  %s144_s24 = int_to_ptr.hbm [resolvable:$true] %s143_s24 }
  0x13   :  { %v129_v59 = vstv %s282_s0 }
  0x14   :  { %v165_v5 = vpop.eup %164  ;;  %v132_v63 = vstv %s284_s1 }
  0x15   :  { %v51_v6 = vmul.f32 32.0, %v165_v5  ;;  %vm55_vm1 = vweird.f32 %v165_v5 }
  0x17   :  { %48 = vadd.xlane.f32.xlu0 %v47_v3  ;;  %v52_v7 = vsub.f32 1.0, %v51_v6 }
  0x19   :  { %v53_v8 = vmul.f32 %v165_v5, %v52_v7 }
  0x1b   :  { %v54_v9 = vadd.f32 %v165_v5, %v53_v8 }
  0x1d   :  { %v56_v10 = vsel %vm55_vm1, %v165_v5, %v54_v9 }
  0x82   :  { %v46_v11 = vpop.xlane.xlu0 %45 }
  0x83   :  { %v57_v12 = vmul.f32 %v56_v10, %v46_v11 }
  0x85   :  { %v272_v13 = vsub.f32 %v41_v0, %v57_v12 }
  0x87   :  { %v61_v14 = vmul.f32 %v272_v13, %v272_v13 }
  0x89   :  { %v63_v15 = vsel %vm43_vm0, %v61_v14, 0.0 }
  0x8a   :  { %64 = vadd.xlane.f32.xlu1 %v63_v15  ;;  %v49_v16 = vpop.xlane.xlu0 %48 }
  0x8b   :  { %v58_v17 = vmul.f32 %v56_v10, %v49_v16 }
  0x8d   :  { %v277_v18 = vsub.f32 %v42_v2, %v58_v17 }
  0x8f   :  { %v62_v19 = vmul.f32 %v277_v18, %v277_v18 }
  0x91   :  { %v66_v20 = vsel %vm43_vm0, %v62_v19, 0.0 }
  0x92   :  { %67 = vadd.xlane.f32.xlu1 %v66_v20 }
  0xfd   :  { %v65_v21 = vpop.xlane.xlu1 %64 }
  0xfe   :  { %v69_v22 = vmul.f32 0.032258064, %v65_v21 }
 0x100   :  { %166 = vrsqrt.f32 %v69_v22  ;;  %vm78_vm2 = vcmp.eq.f32.partialorder %v69_v22, inf  ;;  %v81_v35 = vand.u32 2147483648, %v69_v22  ;;  %vm80_vm3 = vcmp.eq.f32.partialorder %v69_v22, 0.0 }
 0x105   :  { %v68_v23 = vpop.xlane.xlu1 %67 }
 0x106   :  { %v167_v24 = vpop.eup %166  ;;  %v70_v25 = vmul.f32 0.032258064, %v68_v23 }
 0x107   :  { %v72_v26 = vmul.f32 %v167_v24, %v69_v22 }
 0x108   :  { %168 = vrsqrt.f32 %v70_v25  ;;  %vm90_vm4 = vcmp.eq.f32.partialorder %v70_v25, inf  ;;  %v93_v43 = vand.u32 2147483648, %v70_v25  ;;  %vm92_vm5 = vcmp.eq.f32.partialorder %v70_v25, 0.0 }
 0x109   :  { %v73_v27 = vmul.f32 %v167_v24, %v72_v26 }
 0x10b   :  { %v74_v28 = vmul.f32 0.5, %v73_v27 }
 0x10d   :  { %v75_v29 = vsub.f32 1.5, %v74_v28 }
 0x10e   :  { %v169_v30 = vpop.eup %168 }
 0x10f   :  { %v76_v31 = vmul.f32 %v167_v24, %v75_v29  ;;  %v84_v32 = vmul.f32 %v169_v30, %v70_v25 }
 0x111   :  { %v77_v33 = vmul.f32 %v76_v31, %v69_v22  ;;  %v85_v34 = vmul.f32 %v169_v30, %v84_v32 }
 0x113   :  { %v79_v36 = vsel %vm78_vm2, %v69_v22, %v77_v33  ;;  %v86_v37 = vmul.f32 0.5, %v85_v34 }
 0x114   :  { %v82_v38 = vsel %vm80_vm3, %v81_v35, %v79_v36 }
 0x115   :  { %v87_v39 = vsub.f32 1.5, %v86_v37  ;;  %v97_v40 = vadd.f32 1e-06, %v82_v38 }
 0x117   :  { %v88_v41 = vmul.f32 %v169_v30, %v87_v39  ;;  %170 = vrcp.f32 %v97_v40  ;;  %v110_v50 = vand.u32 2147483648, %v97_v40  ;;  %v108_v52 = vand.u32 2147483647, %v97_v40 }
 0x118   :  { %vm104_vm7 = vweird.f32 %v97_v40 }
 0x119   :  { %v89_v42 = vmul.f32 %v88_v41, %v70_v25  ;;  %v111_v55 = vor.u32 1.1754944e-38, %v110_v50  ;;  %vm109_vm9 = vcmp.eq.f32.partialorder %v108_v52, 8.507059e+37 }
 0x11b   :  { %v91_v44 = vsel %vm90_vm4, %v70_v25, %v89_v42 }
 0x11c   :  { %v94_v45 = vsel %vm92_vm5, %v93_v43, %v91_v44 }
 0x11d   :  { %v171_v46 = vpop.eup %170  ;;  %v98_v47 = vadd.f32 1e-06, %v94_v45 }
 0x11e   :  { %v100_v48 = vmul.f32 %v171_v46, %v97_v40  ;;  %vm105_vm6 = vweird.f32 %v171_v46 }
 0x11f   :  { %172 = vrcp.f32 %v98_v47  ;;  %vm106_vm8 = vmor %vm104_vm7, %vm105_vm6  ;;  %v125_v62 = vand.u32 2147483648, %v98_v47  ;;  %v123_v1 = vand.u32 2147483647, %v98_v47  ;;  %vm119_vm11 = vweird.f32 %v98_v47 }
 0x120   :  { %v101_v49 = vsub.f32 1.0, %v100_v48 }
 0x121   :  { %v126_v5 = vor.u32 1.1754944e-38, %v125_v62  ;;  %vm124_vm13 = vcmp.eq.f32.partialorder %v123_v1, 8.507059e+37 }
 0x122   :  { %v102_v51 = vmul.f32 %v171_v46, %v101_v49 }
 0x124   :  { %v103_v53 = vadd.f32 %v171_v46, %v102_v51 }
 0x125   :  { %v173_v54 = vpop.eup %172 }
 0x126   :  { %v107_v56 = vsel %vm106_vm8, %v171_v46, %v103_v53  ;;  %v115_v57 = vmul.f32 %v173_v54, %v98_v47  ;;  %vm120_vm10 = vweird.f32 %v173_v54 }
 0x127   :  { %v112_v58 = vsel %vm109_vm9, %v111_v55, %v107_v56  ;;  %vm121_vm12 = vmor %vm119_vm11, %vm120_vm10 }
 0x128   :  { %v113_v60 = vmul.f32 %v112_v58, %v272_v13  ;;  %v116_v61 = vsub.f32 1.0, %v115_v57 }
 0x12a   :  { %v117_v0 = vmul.f32 %v173_v54, %v116_v61  ;;  %v130_v2 = vmul.f32 %v129_v59, %v113_v60 }
 0x12c   :  { %v118_v3 = vadd.f32 %v173_v54, %v117_v0  ;;  %v133_v4 = vadd.f32 %v132_v63, %v130_v2 }
 0x12e   :  { %v122_v6 = vsel %vm121_vm12, %v173_v54, %v118_v3  ;;  %135 = vst.msk [vmem:[#allocation7] sm:$0xff] %vm43_vm0, %v133_v4 }
 0x12f   :  { %v127_v7 = vsel %vm124_vm13, %v126_v5, %v122_v6 }
 0x130   :  { %v128_v8 = vmul.f32 %v127_v7, %v277_v18 }
 0x132   :  { %v131_v9 = vmul.f32 %v129_v59, %v128_v8 }
 0x134   :  { %v134_v10 = vadd.f32 %v132_v63, %v131_v9 }
 0x136   :  { %136 = vst.msk [vmem:[#allocation7 + $0x8] sm:$0xff] %vm43_vm0, %v134_v10 }
 0x137   :  { %149 = dma.vmem_to_hbm [thread:$0]  %s142_s21, 256, %s144_s24, [#allocation4], %s241_s17, %s241_s17, %s242_s18  }
 0x138   :  { %238 = dma.done.wait [#allocation4], 256  }
 0x139   :  { %239 = vsyncadd [#allocation4], 4294967040 }
 0x13a   :  { %154 = vsyncpa [#allocation3], 1 }
 0x13b   :  { %155 = vsyncpa [#allocation4], 1 }
 0x13c   :  { %156 = vsyncpa [#allocation5], 1 }

</bundles_post_ra>
